<compile_context>
chip_gen: v6e
topology: v6e:2x2x1
jax: 0.10.0
libtpu: 0.0.40
codegen_flags: <defaults>
</compile_context>

<pallas_src>
import jax
import jax.numpy as jnp
from jax.experimental import pallas as pl
from jax.experimental.pallas import tpu as pltpu


def _round_up(x, m):
    return ((x + m - 1) // m) * m


def _tpu_generation():
    try:
        kind = jax.devices()[0].device_kind.lower()
    except Exception:
        return ""
    for gen in ("v7", "v6", "v5"):
        if gen in kind:
            return gen
    return ""


def _tpu_config():
    """-> (generation, max rows per grid step, VMEM limit, dense slab dtype)."""
    gen = _tpu_generation()
    if gen == "v6":        # 128 MiB VMEM, bf16-native VPU/EUP
        return gen, 4096, 96 << 20, jnp.bfloat16
    if gen == "v7":        # 64 MiB VMEM per TC, 2 TCs per chip
        return gen, 2048, 48 << 20, jnp.bfloat16
    if gen == "v5":        # 128 MiB VMEM, no bf16 VPU/EUP -> keep dense in f32
        return gen, 2048, 64 << 20, jnp.float32
    return gen, 2048, 48 << 20, jnp.bfloat16   # conservative defaults


def _make_code2vec_kernel(b_blk, seq_len_pad, seq_len, dense_dtype):
    def kernel(ctx_ref, w_ref, a_ref, out_ref):
        # ctx_ref: (b_blk*Lp, F3p) bf16   w_ref: (F3p, Cp) bf16
        # a_ref:   (1, 1, Cp)      f32    out_ref: (b_blk, Cp) f32
        cp = w_ref.shape[1]

        # One big MXU matmul for the whole batch block, f32 accumulation,
        # tanh on the EUP.  The reused intermediate is stored in `dense_dtype`
        # (bf16 on v6e/v7x): half the VMEM slab and half the vld/vst traffic
        # of the two reuse passes below.
        dense = jnp.tanh(
            jnp.dot(ctx_ref[...], w_ref[...],
                    preferred_element_type=jnp.float32)
        ).astype(dense_dtype)                              # (b_blk*Lp, Cp)

        # Lp is a multiple of 8 and Cp a multiple of 128, so this reshape does
        # not split (8,128) tiles (no relayout copies).
        dense3 = dense.reshape(b_blk, seq_len_pad, cp)

        # Attention scores: VPU multiply (promoted to f32 by the f32 `a`) +
        # XLU lane reduce.  No wasteful N=1 MXU matmul.
        scores = jnp.sum(dense3 * a_ref[...], axis=-1, keepdims=True)

        if seq_len_pad > seq_len:
            # Padded context slots must not leak into the softmax.
            pos = jax.lax.broadcasted_iota(jnp.int32, scores.shape, 1)
            scores = jnp.where(pos < seq_len, scores,
                               jnp.full_like(scores, -jnp.inf))

        # Softmax over the context axis, numerically stabilized; the
        # denominator uses the EUP approximate reciprocal (free slot).
        m = jnp.max(scores, axis=1, keepdims=True)
        p = jnp.exp(scores - m)
        denom = jnp.sum(p, axis=1, keepdims=True)
        attn = p * pl.reciprocal(denom, approx=True)       # (b_blk, Lp, 1) f32

        # Attention-weighted sum over contexts -> code vectors (f32 accum).
        out_ref[...] = jnp.sum(dense3 * attn, axis=1)      # (b_blk, Cp) f32

    return kernel


def _pallas_code2vec(ctx2d, w_p, a_p, *, b_blk, seq_len_pad, seq_len,
                     num_blocks, dense_dtype, vmem_limit,
                     single_buffer_weights):
    rows = b_blk * seq_len_pad
    f3p = ctx2d.shape[1]
    cp = w_p.shape[1]
    bp = num_blocks * b_blk

    # Constant-index operands (fc weight, attention vector) don't need the
    # default second pipeline buffer.
    wkw = {"pipeline_mode": pl.Buffered(1)} if single_buffer_weights else {}

    return pl.pallas_call(
        _make_code2vec_kernel(b_blk, seq_len_pad, seq_len, dense_dtype),
        out_shape=jax.ShapeDtypeStruct((bp, cp), jnp.float32),
        grid_spec=pltpu.PrefetchScalarGridSpec(
            num_scalar_prefetch=0,
            grid=(num_blocks,),
            in_specs=[
                pl.BlockSpec((rows, f3p), lambda i: (i, 0)),
                pl.BlockSpec((f3p, cp), lambda i: (0, 0), **wkw),
                pl.BlockSpec((1, 1, cp), lambda i: (0, 0, 0), **wkw),
            ],
            out_specs=pl.BlockSpec((b_blk, cp), lambda i: (i, 0)),
        ),
        compiler_params=pltpu.CompilerParams(
            dimension_semantics=("parallel",),
            vmem_limit_bytes=vmem_limit,
        ),
    )(ctx2d, w_p, a_p)


def code2vec_forward(starts, paths, ends, masks, params):
    """starts/paths/ends: (B, L) int32; masks: (B, L) (unused, as in PyTorch)."""
    del masks  # accepted but unused, matching the PyTorch module
    gen, max_rows, vmem_limit, dense_dtype = _tpu_config()

    node_emb = params["node_embedding"].astype(jnp.bfloat16)   # (nodes_dim, E)
    path_emb = params["path_embedding"].astype(jnp.bfloat16)   # (paths_dim, E)
    w = params["fc_w"]                                         # (3E, C)
    a = params["a"]                                            # (C, 1)

    # Embedding gather + concat directly in bf16: a single bf16 ctx slab is
    # materialized (no f32 round trip).  Dropout: identity in eval mode.
    ctx = jnp.concatenate(
        [jnp.take(node_emb, starts, axis=0),
         jnp.take(path_emb, paths, axis=0),
         jnp.take(node_emb, ends, axis=0)],
        axis=2)                                                # (B, L, 3E) bf16

    B, L, F3 = ctx.shape
    C = w.shape[1]

    # Pad L to a sublane multiple (masked to -inf inside the kernel) and the
    # output dim to a lane multiple.  The contraction dim is left unpadded
    # when already 8-aligned (saves ctx HBM read traffic).
    Lp = _round_up(L, 8)
    Cp = _round_up(C, 128)
    F3p = F3 if F3 % 8 == 0 else _round_up(F3, 128)

    # Batch block: multiple of 8 sublanes, targeting `max_rows` matmul rows per
    # grid step (amortizes the ~600-cycle per-step overhead and keeps the MXU
    # in long bursts) without blowing up tiny batches.
    b_blk = _round_up(max(1, max_rows // Lp), 8)
    b_blk = min(b_blk, _round_up(B, 8))
    if b_blk * Lp > max_rows:
        b_blk = max(8, (max_rows // Lp) // 8 * 8)
    if gen == "v7" and B >= 16:
        # Guarantee >= 2 grid steps so the "parallel" batch axis can be split
        # across both TensorCores.
        b_blk = min(b_blk, _round_up(B, 16) // 2)
    Bp = _round_up(B, b_blk)
    num_blocks = Bp // b_blk

    # Zero-pad; padded batch rows / feature cols contribute exact zeros to the
    # matmul, padded L slots are masked out of the softmax inside the kernel.
    ctx_p = jnp.pad(ctx, ((0, Bp - B), (0, Lp - L), (0, F3p - F3)))
    ctx2d = ctx_p.reshape(Bp * Lp, F3p)                        # bf16 MXU feed
    w_p = jnp.pad(w, ((0, F3p - F3), (0, Cp - C))).astype(jnp.bfloat16)
    a_p = jnp.pad(a[:, 0], (0, Cp - C)).reshape(1, 1, Cp).astype(jnp.float32)

    kwargs = dict(b_blk=b_blk, seq_len_pad=Lp, seq_len=L,
                  num_blocks=num_blocks, dense_dtype=dense_dtype,
                  vmem_limit=vmem_limit)
    try:
        out = _pallas_code2vec(ctx2d, w_p, a_p,
                               single_buffer_weights=True, **kwargs)
    except Exception:  # pragma: no cover - JAX without pipeline_mode support
        out = _pallas_code2vec(ctx2d, w_p, a_p,
                               single_buffer_weights=False, **kwargs)

    return out[:B, :C]


def reference_forward(starts, paths, ends, masks, params,
                      matmul_dtype=jnp.float32, dense_dtype=jnp.float32):
    """Pure-JAX reference mirroring the PyTorch forward.

    matmul_dtype / dense_dtype let us match the kernel's bf16 MXU-feed and
    bf16 dense-slab precision exactly, while softmax and all accumulations
    stay f32.
    """
    node_emb = params["node_embedding"]
    path_emb = params["path_embedding"]
    w = params["fc_w"]
    a = params["a"]
    ctx = jnp.concatenate(
        [jnp.take(node_emb, starts, axis=0),
         jnp.take(path_emb, paths, axis=0),
         jnp.take(node_emb, ends, axis=0)],
        axis=2)
    dense = jnp.tanh(
        jnp.einsum("blf,fc->blc",
                   ctx.astype(matmul_dtype), w.astype(matmul_dtype),
                   preferred_element_type=jnp.float32))
    dense = dense.astype(dense_dtype).astype(jnp.float32)
    scores = jnp.einsum("blc,co->blo", dense, a)              # (B, L, 1)
    attn = jax.nn.softmax(scores, axis=1)
    return jnp.sum(dense * attn, axis=1)


def init_params(key, nodes_dim, paths_dim, embedding_dim, code_vector_size):
    k1, k2, k3, k4 = jax.random.split(key, 4)
    node_embedding = jax.random.normal(
        k1, (nodes_dim, embedding_dim), dtype=jnp.float32)
    path_embedding = jax.random.normal(
        k2, (paths_dim, embedding_dim), dtype=jnp.float32)
    # torch Linear(3E, C, bias=False): weight (C, 3E); store transposed (3E, C)
    bound = 1.0 / jnp.sqrt(3.0 * embedding_dim)
    fc_w = jax.random.uniform(
        k3, (3 * embedding_dim, code_vector_size),
        minval=-bound, maxval=bound, dtype=jnp.float32)
    # torch.nn.init.uniform_ default is U(0, 1)
    a = jax.random.uniform(
        k4, (code_vector_size, 1), minval=0.0, maxval=1.0, dtype=jnp.float32)
    return {
        "node_embedding": node_embedding,
        "path_embedding": path_embedding,
        "fc_w": fc_w,
        "a": a,
    }


if __name__ == "__main__":
    # small, forward-consistent shapes
    nodes_dim = 50
    paths_dim = 60
    embedding_dim = 32          # -> 3E = 96 (8-aligned, stays unpadded)
    code_vector_size = 64       # padded to 128 inside the wrapper
    B, L = 2, 8

    key = jax.random.PRNGKey(0)
    kp, ks, kpath, ke = jax.random.split(key, 4)
    params = init_params(kp, nodes_dim, paths_dim, embedding_dim,
                         code_vector_size)

    starts = jax.random.randint(ks, (B, L), 0, nodes_dim, dtype=jnp.int32)
    paths = jax.random.randint(kpath, (B, L), 0, paths_dim, dtype=jnp.int32)
    ends = jax.random.randint(ke, (B, L), 0, nodes_dim, dtype=jnp.int32)
    masks = jnp.ones((B, L), dtype=jnp.float32)

    out = code2vec_forward(starts, paths, ends, masks, params)
    out = jax.block_until_ready(out)
    assert out.shape == (B, code_vector_size)

    # Reference at matching precision (bf16 matmul feed + the kernel's dense
    # dtype): tight tolerance.
    _, _, _, dense_dtype = _tpu_config()
    ref_matched = reference_forward(starts, paths, ends, masks, params,
                                    matmul_dtype=jnp.bfloat16,
                                    dense_dtype=dense_dtype)
    assert jnp.allclose(out, ref_matched, atol=1e-2, rtol=1e-2), (
        f"max abs err vs matched ref = {jnp.max(jnp.abs(out - ref_matched))}")

    # Full-f32 reference: loose tolerance (bf16 MXU feed / bf16 dense slab are
    # intentional precision trades per the performance review).
    ref_f32 = reference_forward(starts, paths, ends, masks, params)
    assert jnp.allclose(out, ref_f32, atol=5e-2, rtol=5e-2), (
        f"max abs err vs f32 ref = {jnp.max(jnp.abs(out - ref_f32))}")

    print("KERNEL_OK")
</pallas_src>

<mosaic_0001>
module attributes {stable_mosaic.version = 11 : i64} {
  func.func @kernel(%arg0: i32, %arg1: memref<64x96xbf16, #tpu.memory_space<vmem>>, %arg2: memref<96x128xbf16, #tpu.memory_space<vmem>>, %arg3: memref<1x1x128xf32, #tpu.memory_space<vmem>>, %arg4: memref<8x128xf32, #tpu.memory_space<vmem>>) attributes {dimension_semantics = [#tpu.dimension_semantics<parallel>], iteration_bounds = array<i64: 1>, scalar_prefetch = 0 : i64, scratch_operands = 0 : i64, tpu.core_type = #tpu.core_type<tc>, window_params = [{transform_indices = @transform_0, window_bounds = array<i64: 64, 96>}, {pipeline_mode = #tpu.pipeline_mode<synchronous>, transform_indices = @transform_1, window_bounds = array<i64: 96, 128>}, {pipeline_mode = #tpu.pipeline_mode<synchronous>, transform_indices = @transform_2, window_bounds = array<i64: 1, 1, 128>}, {transform_indices = @transform_3, window_bounds = array<i64: 8, 128>}]} {
    %c0 = arith.constant 0 : index
    %c0_0 = arith.constant 0 : index
    %0 = vector.load %arg1[%c0, %c0_0] : memref<64x96xbf16, #tpu.memory_space<vmem>>, vector<64x96xbf16>
    %c0_1 = arith.constant 0 : index
    %c0_2 = arith.constant 0 : index
    %1 = vector.load %arg2[%c0_1, %c0_2] : memref<96x128xbf16, #tpu.memory_space<vmem>>, vector<96x128xbf16>
    %cst = arith.constant dense<0.000000e+00> : vector<64x128xf32>
    %2 = tpu.matmul %0, %1, %cst {dimension_numbers = #tpu.dot_dimension_numbers<[1], [0], [0], [1], [0, 0, 1, 1], [], []>} : vector<64x96xbf16>, vector<96x128xbf16>, vector<64x128xf32> -> vector<64x128xf32>
    %3 = math.tanh %2 : vector<64x128xf32>
    %4 = arith.truncf %3 : vector<64x128xf32> to vector<64x128xbf16>
    %5 = vector.shape_cast %4 : vector<64x128xbf16> to vector<8x8x128xbf16>
    %c0_3 = arith.constant 0 : index
    %c0_4 = arith.constant 0 : index
    %c0_5 = arith.constant 0 : index
    %6 = vector.load %arg3[%c0_3, %c0_4, %c0_5] : memref<1x1x128xf32, #tpu.memory_space<vmem>>, vector<1x1x128xf32>
    %7 = arith.extf %5 : vector<8x8x128xbf16> to vector<8x8x128xf32>
    %8 = vector.broadcast %6 : vector<1x1x128xf32> to vector<8x8x128xf32>
    %9 = arith.mulf %7, %8 : vector<8x8x128xf32>
    %cst_6 = arith.constant dense<0.000000e+00> : vector<8x8xf32>
    %10 = vector.multi_reduction <add>, %9, %cst_6 [2] : vector<8x8x128xf32> to vector<8x8xf32>
    %11 = vector.shape_cast %10 : vector<8x8xf32> to vector<8x8x1xf32>
    %cst_7 = arith.constant dense<0xFF800000> : vector<8x1xf32>
    %12 = vector.multi_reduction <maximumf>, %11, %cst_7 [1] : vector<8x8x1xf32> to vector<8x1xf32>
    %13 = vector.shape_cast %12 : vector<8x1xf32> to vector<8x1x1xf32>
    %14 = vector.broadcast %13 : vector<8x1x1xf32> to vector<8x8x1xf32>
    %15 = arith.subf %11, %14 : vector<8x8x1xf32>
    %16 = math.exp %15 : vector<8x8x1xf32>
    %cst_8 = arith.constant dense<0.000000e+00> : vector<8x1xf32>
    %17 = vector.multi_reduction <add>, %16, %cst_8 [1] : vector<8x8x1xf32> to vector<8x1xf32>
    %18 = vector.shape_cast %17 : vector<8x1xf32> to vector<8x1x1xf32>
    %19 = tpu.reciprocal %18 {approx = true} : vector<8x1x1xf32> -> vector<8x1x1xf32>
    %20 = vector.broadcast %19 : vector<8x1x1xf32> to vector<8x8x1xf32>
    %21 = arith.mulf %16, %20 : vector<8x8x1xf32>
    %22 = arith.extf %5 : vector<8x8x128xbf16> to vector<8x8x128xf32>
    %23 = vector.broadcast %21 : vector<8x8x1xf32> to vector<8x8x128xf32>
    %24 = arith.mulf %22, %23 : vector<8x8x128xf32>
    %cst_9 = arith.constant dense<0.000000e+00> : vector<8x128xf32>
    %25 = vector.multi_reduction <add>, %24, %cst_9 [1] : vector<8x8x128xf32> to vector<8x128xf32>
    %c0_10 = arith.constant 0 : index
    %c0_11 = arith.constant 0 : index
    %26 = vector.load %arg4[%c0_10, %c0_11] : memref<8x128xf32, #tpu.memory_space<vmem>>, vector<8x128xf32>
    tpu.vector_store %arg4[%c0_10, %c0_11], %25 {strides = array<i32>} : memref<8x128xf32, #tpu.memory_space<vmem>>, vector<8x128xf32>,
    return
  }
  func.func @transform_0(%arg0: i32) -> (i32, i32) {
    %c0_i32 = arith.constant 0 : i32
    %c0_i32_0 = arith.constant 0 : i32
    return %arg0, %c0_i32 : i32, i32
  }
  func.func @transform_1(%arg0: i32) -> (i32, i32) {
    %c0_i32 = arith.constant 0 : i32
    %c0_i32_0 = arith.constant 0 : i32
    %c0_i32_1 = arith.constant 0 : i32
    return %c0_i32, %c0_i32_0 : i32, i32
  }
  func.func @transform_2(%arg0: i32) -> (i32, i32, i32) {
    %c0_i32 = arith.constant 0 : i32
    %c0_i32_0 = arith.constant 0 : i32
    %c0_i32_1 = arith.constant 0 : i32
    %c0_i32_2 = arith.constant 0 : i32
    return %c0_i32, %c0_i32_0, %c0_i32_1 : i32, i32, i32
  }
  func.func @transform_3(%arg0: i32) -> (i32, i32) {
    %c0_i32 = arith.constant 0 : i32
    %c0_i32_0 = arith.constant 0 : i32
    return %arg0, %c0_i32 : i32, i32
  }
}

module attributes {stable_mosaic.version = 11 : i64} {
  func.func @kernel(%arg0: i32, %arg1: memref<64x96xbf16, #tpu.memory_space<vmem>>, %arg2: memref<96x128xbf16, #tpu.memory_space<vmem>>, %arg3: memref<1x1x128xf32, #tpu.memory_space<vmem>>, %arg4: memref<8x128xf32, #tpu.memory_space<vmem>>) attributes {dimension_semantics = [#tpu.dimension_semantics<parallel>], iteration_bounds = array<i64: 1>, scalar_prefetch = 0 : i64, scratch_operands = 0 : i64, tpu.core_type = #tpu.core_type<tc>, window_params = [{transform_indices = @transform_0, window_bounds = array<i64: 64, 96>}, {pipeline_mode = #tpu.pipeline_mode<synchronous>, transform_indices = @transform_1, window_bounds = array<i64: 96, 128>}, {pipeline_mode = #tpu.pipeline_mode<synchronous>, transform_indices = @transform_2, window_bounds = array<i64: 1, 1, 128>}, {transform_indices = @transform_3, window_bounds = array<i64: 8, 128>}]} {
    %c0 = arith.constant 0 : index
    %c0_0 = arith.constant 0 : index
    %0 = vector.load %arg1[%c0, %c0_0] : memref<64x96xbf16, #tpu.memory_space<vmem>>, vector<64x96xbf16>
    %c0_1 = arith.constant 0 : index
    %c0_2 = arith.constant 0 : index
    %1 = vector.load %arg2[%c0_1, %c0_2] : memref<96x128xbf16, #tpu.memory_space<vmem>>, vector<96x128xbf16>
    %cst = arith.constant dense<0.000000e+00> : vector<64x128xf32>
    %2 = tpu.matmul %0, %1, %cst {dimension_numbers = #tpu.dot_dimension_numbers<[1], [0], [0], [1], [0, 0, 1, 1], [], []>} : vector<64x96xbf16>, vector<96x128xbf16>, vector<64x128xf32> -> vector<64x128xf32>
    %3 = math.tanh %2 : vector<64x128xf32>
    %4 = arith.truncf %3 : vector<64x128xf32> to vector<64x128xbf16>
    %5 = vector.shape_cast %4 : vector<64x128xbf16> to vector<8x8x128xbf16>
    %c0_3 = arith.constant 0 : index
    %c0_4 = arith.constant 0 : index
    %c0_5 = arith.constant 0 : index
    %6 = vector.load %arg3[%c0_3, %c0_4, %c0_5] : memref<1x1x128xf32, #tpu.memory_space<vmem>>, vector<1x1x128xf32>
    %7 = arith.extf %5 : vector<8x8x128xbf16> to vector<8x8x128xf32>
    %8 = vector.broadcast %6 : vector<1x1x128xf32> to vector<8x8x128xf32>
    %9 = arith.mulf %7, %8 : vector<8x8x128xf32>
    %cst_6 = arith.constant dense<0.000000e+00> : vector<8x8xf32>
    %10 = vector.multi_reduction <add>, %9, %cst_6 [2] : vector<8x8x128xf32> to vector<8x8xf32>
    %11 = vector.shape_cast %10 : vector<8x8xf32> to vector<8x8x1xf32>
    %cst_7 = arith.constant dense<0xFF800000> : vector<8x1xf32>
    %12 = vector.multi_reduction <maximumf>, %11, %cst_7 [1] : vector<8x8x1xf32> to vector<8x1xf32>
    %13 = vector.shape_cast %12 : vector<8x1xf32> to vector<8x1x1xf32>
    %14 = vector.broadcast %13 : vector<8x1x1xf32> to vector<8x8x1xf32>
    %15 = arith.subf %11, %14 : vector<8x8x1xf32>
    %16 = math.exp %15 : vector<8x8x1xf32>
    %cst_8 = arith.constant dense<0.000000e+00> : vector<8x1xf32>
    %17 = vector.multi_reduction <add>, %16, %cst_8 [1] : vector<8x8x1xf32> to vector<8x1xf32>
    %18 = vector.shape_cast %17 : vector<8x1xf32> to vector<8x1x1xf32>
    %19 = tpu.reciprocal %18 {approx = true} : vector<8x1x1xf32> -> vector<8x1x1xf32>
    %20 = vector.broadcast %19 : vector<8x1x1xf32> to vector<8x8x1xf32>
    %21 = arith.mulf %16, %20 : vector<8x8x1xf32>
    %22 = arith.extf %5 : vector<8x8x128xbf16> to vector<8x8x128xf32>
    %23 = vector.broadcast %21 : vector<8x8x1xf32> to vector<8x8x128xf32>
    %24 = arith.mulf %22, %23 : vector<8x8x128xf32>
    %cst_9 = arith.constant dense<0.000000e+00> : vector<8x128xf32>
    %25 = vector.multi_reduction <add>, %24, %cst_9 [1] : vector<8x8x128xf32> to vector<8x128xf32>
    %c0_10 = arith.constant 0 : index
    %c0_11 = arith.constant 0 : index
    %26 = vector.load %arg4[%c0_10, %c0_11] : memref<8x128xf32, #tpu.memory_space<vmem>>, vector<8x128xf32>
    tpu.vector_store %arg4[%c0_10, %c0_11], %25 {strides = array<i32>} : memref<8x128xf32, #tpu.memory_space<vmem>>, vector<8x128xf32>,
    return
  }
  func.func @transform_0(%arg0: i32) -> (i32, i32) {
    %c0_i32 = arith.constant 0 : i32
    %c0_i32_0 = arith.constant 0 : i32
    return %arg0, %c0_i32 : i32, i32
  }
  func.func @transform_1(%arg0: i32) -> (i32, i32) {
    %c0_i32 = arith.constant 0 : i32
    %c0_i32_0 = arith.constant 0 : i32
    %c0_i32_1 = arith.constant 0 : i32
    return %c0_i32, %c0_i32_0 : i32, i32
  }
  func.func @transform_2(%arg0: i32) -> (i32, i32, i32) {
    %c0_i32 = arith.constant 0 : i32
    %c0_i32_0 = arith.constant 0 : i32
    %c0_i32_1 = arith.constant 0 : i32
    %c0_i32_2 = arith.constant 0 : i32
    return %c0_i32, %c0_i32_0, %c0_i32_1 : i32, i32, i32
  }
  func.func @transform_3(%arg0: i32) -> (i32, i32) {
    %c0_i32 = arith.constant 0 : i32
    %c0_i32_0 = arith.constant 0 : i32
    return %arg0, %c0_i32 : i32, i32
  }
}

</mosaic_0001>

<bundles_post_ra>
// kernel: tpu_custom_call.1
= control target key start
LH: loop header
LB: loop body
LE: loop exit
PB: predicated region body
PF: predicated region fallthrough
CT: control target
= control target key end

     0   :  { %8 = vsyncpa [#allocation3], 0  ;;  %s824_s0 = inlined_call_operand.hbm [shape: bf16[64,96], index: 0, kind: input, shape index: {}]   ;;  %s825_s1 = inlined_call_operand.hbm [shape: bf16[96,128], index: 1, kind: input, shape index: {}]   ;;  %s826_s2 = inlined_call_operand.vmem [shape: f32[1,1,128], index: 2, kind: input, shape index: {}]   ;;  %s827_s3 = inlined_call_operand.hbm [shape: f32[8,128], index: 3, kind: output, shape index: {}]  }
   0x1   :  { %9 = vsyncpa [#allocation6], 0 }
   0x2   :  { %10 = vsyncpa [#allocation4], 0  ;;  %s711_s12 = smov [#allocation2]  }
   0x3   :  { %s16_s13 = sshll.u32 %s711_s12, 4  ;;  %s17_s13 = int_to_ptr.vmem [resolvable:$true] %s16_s13 }
   0x4   :  { %s653_s14 = scalar_lea.vmem %s17_s13, 512  ;;  %p658_p1 = scmp.lt.s32.totalorder %s17_s13, %s17_s13 }
   0x5   :  { %p654_p0 = scmp.ne.s32.totalorder %s17_s13, %s653_s14  ;;  %p659_p2 = scmp.lt.s32.totalorder %s653_s14, %s653_s14 }
   0x7   :  { %p660_p3 = por %p659_p2, %p658_p1 }
   0x9   :  { %p661_p4 = pnand %p660_p3, %p654_p0 }
   0xb   :  { %664 = shalt.err (!%p661_p4)
}
   0xc   :  { %s712_s15 = smov 64   ;;  %s713_s16 = smov 4  }
   0xd   :  { %22 = dma.hbm_to_vmem [thread:$0]  %s824_s0, 512, %s17_s13, [#allocation3], %s712_s15, %s712_s15, %s713_s16  }
   0xe   :  { %s714_s19 = smov [#allocation5]  }
   0xf   :  { %s28_s20 = sshll.u32 %s714_s19, 4  ;;  %s29_s20 = int_to_ptr.vmem [resolvable:$true] %s28_s20 }
  0x10   :  { %s673_s21 = scalar_lea.vmem %s29_s20, 768  ;;  %p678_p6 = scmp.lt.s32.totalorder %s29_s20, %s29_s20 }
  0x11   :  { %p674_p5 = scmp.ne.s32.totalorder %s29_s20, %s673_s21  ;;  %p679_p7 = scmp.lt.s32.totalorder %s673_s21, %s673_s21 }
  0x13   :  { %p680_p8 = por %p679_p7, %p678_p6 }
  0x15   :  { %p681_p9 = pnand %p680_p8, %p674_p5 }
  0x17   :  { %684 = shalt.err (!%p681_p9)
}
  0x18   :  { %34 = dma.hbm_to_vmem [thread:$0]  %s825_s1, 768, %s29_s20, [#allocation6], %s712_s15, %s712_s15, %s713_s16  }
  0x19   :  { %705 = dma.done.wait [#allocation3], 512  }
  0x1a   :  { %706 = vsyncadd [#allocation3], 4294966784 }
  0x1b   :  { %707 = dma.done.wait [#allocation6], 768  }
  0x1c   :  { %708 = vsyncadd [#allocation6], 4294966528  ;;  %v587_v0 = vld [vmem:[#allocation5 + $0x28] sm:$0xff]   ;;  %v588_v1 = vld [vmem:[#allocation5 + $0x20] sm:$0xff]   ;;  %vm120_vm0 = vcmask 785408   ;;  %vm477_vm1 = vcmask 1041409  }
  0x1d   :  { %550 = vmatprep.subr.bf16.mxu0 %v587_v0  ;;  %570 = vmatprep.subr.bf16.mxu1 %v587_v0  ;;  %v589_v2 = vld [vmem:[#allocation5 + $0x18] sm:$0xff]   ;;  %v593_v3 = vld [vmem:[#allocation2] sm:$0xff]   ;;  %v594_v4 = vld [vmem:[#allocation2 + $0x10] sm:$0xff]   ;;  %vm479_vm2 = vcmask 1042434   ;;  %vm481_vm3 = vcmask 1043459   ;;  %vm483_vm4 = vcmask 1044484  }
  0x1e   :  { %551 = vmatpush3.bf16.msra.mxu0 %v587_v0  ;;  %576 = vmatpush3.bf16.msra.mxu1 %v587_v0  ;;  %v590_v5 = vld [vmem:[#allocation5 + $0x10] sm:$0xff]   ;;  %v591_v6 = vld [vmem:[#allocation5 + $0x8] sm:$0xff]   ;;  %v592_v7 = vld [vmem:[#allocation5] sm:$0xff]   ;;  %vm485_vm5 = vcmask 1045509   ;;  %vm487_vm6 = vcmask 1046534   ;;  %vm489_vm7 = vcmask 1047559  }
  0x1f   :  { %552 = vmatprep.subr.bf16.mxu0 %v588_v1  ;;  %571 = vmatprep.subr.bf16.mxu1 %v588_v1  ;;  %v595_v8 = vld [vmem:[#allocation2 + $0x8] sm:$0xff]   ;;  %v596_v9 = vld [vmem:[#allocation2 + $0x18] sm:$0xff]   ;;  %v531_v21 = vld [vmem:[%s826_s2] ss:$0 sm:$0xff]  ;;  %s715_s2 = smov [#allocation7]  }
  0x20   :  { %562 = vmatprep.mubr.msk.bf16.mxu0 %vm120_vm0, %v593_v3  ;;  %566 = vmatprep.mubr.msk.bf16.mxu1 %vm120_vm0, %v594_v4  ;;  %s499_s24 = sshll.u32 %s715_s2, 4  ;;  %s500_s24 = int_to_ptr.vmem [resolvable:$true] %s499_s24 }
  0x21   :  { %s685_s25 = scalar_lea.vmem %s500_s24, 128  ;;  %p690_p11 = scmp.lt.s32.totalorder %s500_s24, %s500_s24 }
  0x22   :  { %553 = vmatpush3.bf16.msra.mxu0 %v588_v1  ;;  %577 = vmatpush3.bf16.msra.mxu1 %v588_v1  ;;  %p686_p10 = scmp.ne.s32.totalorder %s500_s24, %s685_s25  ;;  %p691_p12 = scmp.lt.s32.totalorder %s685_s25, %s685_s25 }
  0x23   :  { %554 = vmatprep.subr.bf16.mxu0 %v589_v2  ;;  %572 = vmatprep.subr.bf16.mxu1 %v589_v2 }
  0x24   :  { %p692_p13 = por %p691_p12, %p690_p11 }
  0x26   :  { %555 = vmatpush3.bf16.msra.mxu0 %v589_v2  ;;  %578 = vmatpush3.bf16.msra.mxu1 %v589_v2  ;;  %p693_p0 = pnand %p692_p13, %p686_p10 }
  0x27   :  { %556 = vmatprep.subr.bf16.mxu0 %v590_v5  ;;  %573 = vmatprep.subr.bf16.mxu1 %v590_v5 }
  0x2a   :  { %557 = vmatpush3.bf16.msra.mxu0 %v590_v5  ;;  %579 = vmatpush3.bf16.msra.mxu1 %v590_v5 }
  0x2b   :  { %558 = vmatprep.subr.bf16.mxu0 %v591_v6  ;;  %574 = vmatprep.subr.bf16.mxu1 %v591_v6 }
  0x2e   :  { %559 = vmatpush3.bf16.msra.mxu0 %v591_v6  ;;  %580 = vmatpush3.bf16.msra.mxu1 %v591_v6 }
  0x2f   :  { %560 = vmatprep.subr.bf16.mxu0 %v592_v7  ;;  %575 = vmatprep.subr.bf16.mxu1 %v592_v7 }
  0x32   :  { %561 = vmatpush3.bf16.msra.mxu0 %v592_v7  ;;  %581 = vmatpush3.bf16.msra.mxu1 %v592_v7 }
  0x35   :  { %563 = vmatmul.mubr.msk.bf16.vlgmr.msra.gmra.mxu0 %vm120_vm0, %v595_v8  ;;  %567 = vmatmul.mubr.msk.bf16.vlgmr.msra.gmra.mxu1 %vm120_vm0, %v596_v9 }
  0xf5   :  { %v564_v10 = vpop.f32.mrf.mxu0  ;;  %v568_v11 = vpop.f32.mrf.mxu1 }
  0xf6   :  { %597 = vtanh.f32 %v564_v10 }
  0xf7   :  { %v167_v12 = vpop.f32.mrf.mxu0  ;;  %v183_v13 = vpop.f32.mrf.mxu1 }
  0xf8   :  { %599 = vtanh.f32 %v167_v12 }
  0xf9   :  { %601 = vtanh.f32 %v183_v13  ;;  %v565_v14 = vpop.f32.mrf.mxu0  ;;  %v569_v15 = vpop.f32.mrf.mxu1 }
  0xfa   :  { %603 = vtanh.f32 %v565_v14 }
  0xfb   :  { %605 = vtanh.f32 %v569_v15  ;;  %v170_v16 = vpop.f32.mrf.mxu0  ;;  %v186_v17 = vpop.f32.mrf.mxu1 }
  0xfc   :  { %607 = vtanh.f32 %v170_v16 }
  0xfd   :  { %609 = vtanh.f32 %v186_v17 }
  0xfe   :  { %611 = vtanh.f32 %v568_v11 }
 0x103   :  { %v598_v18 = vpop.eup %597 }
 0x104   :  { %v534_v19 = vpack.c.bf16 %v598_v18, %v598_v18 }
 0x105   :  { %v600_v20 = vpop.eup %599 }
 0x106   :  { %v602_v22 = vpop.eup %601  ;;  %v749_v23 = vunpack.c.l.bf16 %v534_v19  ;;  %v532_v24 = vpack.c.bf16 %v600_v20, %v600_v20 }
 0x107   :  { %v604_v25 = vpop.eup %603  ;;  %v536_v35 = vpack.c.bf16 %v602_v22, %v602_v22 }
 0x108   :  { %v606_v26 = vpop.eup %605  ;;  %v255_v27 = vmul.f32 %v531_v21, %v749_v23  ;;  %v752_v28 = vunpack.c.l.bf16 %v532_v24  ;;  %v535_v29 = vpack.c.bf16 %v604_v25, %v604_v25 }
 0x109   :  { %v608_v30 = vpop.eup %607  ;;  %v539_v40 = vpack.c.bf16 %v606_v26, %v606_v26  ;;  %v763_v43 = vunpack.c.l.bf16 %v536_v35 }
 0x10a   :  { %v610_v31 = vpop.eup %609  ;;  %v533_v32 = vpack.c.bf16 %v608_v30, %v608_v30  ;;  %265 = vadd.xlane.f32.xlu1 %v255_v27  ;;  %v253_v33 = vmul.f32 %v531_v21, %v752_v28  ;;  %v755_v34 = vunpack.c.l.bf16 %v535_v29 }
 0x10b   :  { %v612_v36 = vpop.eup %611  ;;  %v537_v37 = vpack.c.bf16 %v610_v31, %v610_v31  ;;  %v766_v46 = vunpack.c.l.bf16 %v539_v40  ;;  %v257_v47 = vmul.f32 %v531_v21, %v763_v43 }
 0x10c   :  { %261 = vadd.xlane.f32.xlu0 %v253_v33  ;;  %v256_v38 = vmul.f32 %v531_v21, %v755_v34  ;;  %v758_v39 = vunpack.c.l.bf16 %v533_v32  ;;  %v538_v44 = vpack.c.bf16 %v612_v36, %v612_v36 }
 0x10d   :  { %v760_v41 = vunpack.c.l.bf16 %v537_v37  ;;  %v260_v49 = vmul.f32 %v531_v21, %v766_v46 }
 0x10e   :  { %267 = vadd.xlane.f32.xlu1 %v256_v38  ;;  %v254_v42 = vmul.f32 %v531_v21, %v758_v39  ;;  %v769_v48 = vunpack.c.l.bf16 %v538_v44 }
 0x10f   :  { %v258_v45 = vmul.f32 %v531_v21, %v760_v41 }
 0x110   :  { %263 = vadd.xlane.f32.xlu0 %v254_v42  ;;  %v259_v50 = vmul.f32 %v531_v21, %v769_v48 }
 0x112   :  { %271 = vadd.xlane.f32.xlu1 %v258_v45 }
 0x114   :  { %269 = vadd.xlane.f32.xlu0 %v257_v47 }
 0x116   :  { %275 = vadd.xlane.f32.xlu1 %v260_v49 }
 0x118   :  { %273 = vadd.xlane.f32.xlu0 %v259_v50 }
 0x193   :  { %v266_v51 = vpop.xlane.xlu1 %265 }
 0x194   :  { %v289_v52 = vrot.slane %v266_v51, 4 }
 0x195   :  { %v262_v53 = vpop.xlane.xlu0 %261 }
 0x196   :  { %v290_v54 = vmax.f32 %v266_v51, %v289_v52  ;;  %v277_v55 = vrot.slane %v262_v53, 4 }
 0x197   :  { %v268_v56 = vpop.xlane.xlu1 %267 }
 0x198   :  { %v291_v57 = vrot.slane %v290_v54, 2  ;;  %v278_v58 = vmax.f32 %v262_v53, %v277_v55  ;;  %v295_v59 = vrot.slane %v268_v56, 4 }
 0x199   :  { %v264_v60 = vpop.xlane.xlu0 %263 }
 0x19a   :  { %v292_v61 = vmax.f32 %v290_v54, %v291_v57  ;;  %v279_v62 = vrot.slane %v278_v58, 2  ;;  %v296_v63 = vmax.f32 %v268_v56, %v295_v59  ;;  %v283_v0 = vrot.slane %v264_v60, 4 }
 0x19b   :  { %v272_v1 = vpop.xlane.xlu1 %271 }
 0x19c   :  { %v293_v2 = vrot.slane %v292_v61, 1  ;;  %v280_v3 = vmax.f32 %v278_v58, %v279_v62  ;;  %v297_v4 = vrot.slane %v296_v63, 2  ;;  %v284_v5 = vmax.f32 %v264_v60, %v283_v0 }
 0x19d   :  { %v307_v6 = vrot.slane %v272_v1, 4  ;;  %v270_v7 = vpop.xlane.xlu0 %269 }
 0x19e   :  { %v294_v8 = vmax.f32 %v292_v61, %v293_v2  ;;  %v281_v9 = vrot.slane %v280_v3, 1  ;;  %v298_v10 = vmax.f32 %v296_v63, %v297_v4  ;;  %v285_v11 = vrot.slane %v284_v5, 2 }
 0x19f   :  { %v308_v12 = vmax.f32 %v272_v1, %v307_v6  ;;  %v301_v13 = vrot.slane %v270_v7, 4  ;;  %v276_v14 = vpop.xlane.xlu1 %275 }
 0x1a0   :  { %v327_v15 = vsub.f32 %v266_v51, %v294_v8  ;;  %v282_v16 = vmax.f32 %v280_v3, %v281_v9  ;;  %v299_v17 = vrot.slane %v298_v10, 1  ;;  %v286_v18 = vmax.f32 %v284_v5, %v285_v11 }
 0x1a1   :  { %v309_v19 = vrot.slane %v308_v12, 2  ;;  %v302_v20 = vmax.f32 %v270_v7, %v301_v13  ;;  %v319_v21 = vrot.slane %v276_v14, 4  ;;  %v274_v22 = vpop.xlane.xlu0 %273 }
 0x1a2   :  { %v337_v24 = vmul.f32 1.442695, %v327_v15  ;;  %v325_v25 = vsub.f32 %v262_v53, %v282_v16  ;;  %v300_v26 = vmax.f32 %v298_v10, %v299_v17  ;;  %v287_v27 = vrot.slane %v286_v18, 1 }
 0x1a3   :  { %v310_v29 = vmax.f32 %v308_v12, %v309_v19  ;;  %v303_v30 = vrot.slane %v302_v20, 2  ;;  %v320_v31 = vmax.f32 %v276_v14, %v319_v21  ;;  %v313_v32 = vrot.slane %v274_v22, 4 }
 0x1a4   :  { %613 = vpow2.f32 %v337_v24  ;;  %v333_v33 = vmul.f32 1.442695, %v325_v25  ;;  %v328_v35 = vsub.f32 %v268_v56, %v300_v26  ;;  %v288_v36 = vmax.f32 %v286_v18, %v287_v27 }
 0x1a5   :  { %v311_v37 = vrot.slane %v310_v29, 1  ;;  %v304_v38 = vmax.f32 %v302_v20, %v303_v30  ;;  %v321_v40 = vrot.slane %v320_v31, 2  ;;  %v314_v42 = vmax.f32 %v274_v22, %v313_v32 }
 0x1a6   :  { %615 = vpow2.f32 %v333_v33  ;;  %v339_v44 = vmul.f32 1.442695, %v328_v35  ;;  %v326_v45 = vsub.f32 %v264_v60, %v288_v36 }
 0x1a7   :  { %v312_v47 = vmax.f32 %v310_v29, %v311_v37  ;;  %v305_v49 = vrot.slane %v304_v38, 1  ;;  %v322_v50 = vmax.f32 %v320_v31, %v321_v40  ;;  %v315_v51 = vrot.slane %v314_v42, 2 }
 0x1a8   :  { %617 = vpow2.f32 %v339_v44  ;;  %v335_v52 = vmul.f32 1.442695, %v326_v45 }
 0x1a9   :  { %v330_v53 = vsub.f32 %v272_v1, %v312_v47  ;;  %v306_v54 = vmax.f32 %v304_v38, %v305_v49  ;;  %v323_v55 = vrot.slane %v322_v50, 1  ;;  %v316_v57 = vmax.f32 %v314_v42, %v315_v51 }
 0x1aa   :  { %619 = vpow2.f32 %v335_v52 }
 0x1ab   :  { %v343_v56 = vmul.f32 1.442695, %v330_v53  ;;  %v329_v58 = vsub.f32 %v270_v7, %v306_v54  ;;  %v324_v59 = vmax.f32 %v322_v50, %v323_v55  ;;  %v317_v61 = vrot.slane %v316_v57, 1 }
 0x1ad   :  { %621 = vpow2.f32 %v343_v56  ;;  %v341_v62 = vmul.f32 1.442695, %v329_v58  ;;  %v332_v63 = vsub.f32 %v276_v14, %v324_v59  ;;  %v318_v0 = vmax.f32 %v316_v57, %v317_v61 }
 0x1af   :  { %623 = vpow2.f32 %v341_v62  ;;  %v347_v60 = vmul.f32 1.442695, %v332_v63  ;;  %v331_v2 = vsub.f32 %v274_v22, %v318_v0 }
 0x1b1   :  { %v773_v3 = vpop.eup %613  ;;  %625 = vpow2.f32 %v347_v60  ;;  %v345_v4 = vmul.f32 1.442695, %v331_v2 }
 0x1b2   :  { %v361_v1 = vrot.slane %v773_v3, 4 }
 0x1b3   :  { %v776_v5 = vpop.eup %615  ;;  %627 = vpow2.f32 %v345_v4 }
 0x1b4   :  { %v362_v6 = vadd.f32 %v773_v3, %v361_v1  ;;  %v349_v7 = vrot.slane %v776_v5, 4 }
 0x1b5   :  { %v780_v8 = vpop.eup %617 }
 0x1b6   :  { %v363_v9 = vrot.slane %v362_v6, 2  ;;  %v350_v10 = vadd.f32 %v776_v5, %v349_v7  ;;  %v367_v11 = vrot.slane %v780_v8, 4 }
 0x1b7   :  { %v784_v12 = vpop.eup %619 }
 0x1b8   :  { %v364_v13 = vadd.f32 %v363_v9, %v362_v6  ;;  %v351_v14 = vrot.slane %v350_v10, 2  ;;  %v368_v15 = vadd.f32 %v780_v8, %v367_v11  ;;  %v355_v16 = vrot.slane %v784_v12, 4 }
 0x1ba   :  { %v788_v17 = vpop.eup %621  ;;  %v365_v18 = vrot.slane %v364_v13, 1  ;;  %v352_v19 = vadd.f32 %v351_v14, %v350_v10  ;;  %v369_v20 = vrot.slane %v368_v15, 2  ;;  %v356_v21 = vadd.f32 %v784_v12, %v355_v16 }
 0x1bb   :  { %v379_v22 = vrot.slane %v788_v17, 4 }
 0x1bc   :  { %v792_v24 = vpop.eup %623  ;;  %v366_v25 = vadd.f32 %v365_v18, %v364_v13  ;;  %v353_v26 = vrot.slane %v352_v19, 1  ;;  %v370_v27 = vadd.f32 %v369_v20, %v368_v15  ;;  %v357_v29 = vrot.slane %v356_v21, 2 }
 0x1bd   :  { %v380_v30 = vadd.f32 %v788_v17, %v379_v22  ;;  %v373_v31 = vrot.slane %v792_v24, 4 }
 0x1be   :  { %v796_v32 = vpop.eup %625  ;;  %v354_v33 = vadd.f32 %v353_v26, %v352_v19  ;;  %v371_v35 = vrot.slane %v370_v27, 1  ;;  %v358_v36 = vadd.f32 %v357_v29, %v356_v21  ;;  %629 = vrcp.f32 %v366_v25 }
 0x1bf   :  { %v381_v37 = vrot.slane %v380_v30, 2  ;;  %v374_v38 = vadd.f32 %v792_v24, %v373_v31  ;;  %v391_v40 = vrot.slane %v796_v32, 4 }
 0x1c0   :  { %v800_v42 = vpop.eup %627  ;;  %631 = vrcp.f32 %v354_v33  ;;  %v359_v44 = vrot.slane %v358_v36, 1  ;;  %v372_v45 = vadd.f32 %v371_v35, %v370_v27 }
 0x1c1   :  { %v375_v47 = vrot.slane %v374_v38, 2  ;;  %v385_v49 = vrot.slane %v800_v42, 4  ;;  %v382_v50 = vadd.f32 %v381_v37, %v380_v30  ;;  %v392_v51 = vadd.f32 %v796_v32, %v391_v40 }
 0x1c2   :  { %v360_v52 = vadd.f32 %v359_v44, %v358_v36  ;;  %633 = vrcp.f32 %v372_v45 }
 0x1c3   :  { %v376_v53 = vadd.f32 %v375_v47, %v374_v38  ;;  %v386_v54 = vadd.f32 %v800_v42, %v385_v49  ;;  %v383_v55 = vrot.slane %v382_v50, 1  ;;  %v393_v57 = vrot.slane %v392_v51, 2 }
 0x1c4   :  { %635 = vrcp.f32 %v360_v52 }
 0x1c5   :  { %v377_v56 = vrot.slane %v376_v53, 1  ;;  %v384_v58 = vadd.f32 %v383_v55, %v382_v50  ;;  %v387_v59 = vrot.slane %v386_v54, 2  ;;  %v394_v61 = vadd.f32 %v393_v57, %v392_v51 }
 0x1c7   :  { %v378_v62 = vadd.f32 %v377_v56, %v376_v53  ;;  %v388_v63 = vadd.f32 %v387_v59, %v386_v54  ;;  %v395_v0 = vrot.slane %v394_v61, 1  ;;  %637 = vrcp.f32 %v384_v58 }
 0x1c9   :  { %v389_v60 = vrot.slane %v388_v63, 1  ;;  %v396_v2 = vadd.f32 %v395_v0, %v394_v61  ;;  %639 = vrcp.f32 %v378_v62 }
 0x1cb   :  { %v630_v4 = vpop.eup %629  ;;  %v390_v1 = vadd.f32 %v389_v60, %v388_v63  ;;  %641 = vrcp.f32 %v396_v2 }
 0x1cc   :  { %v407_v6 = vmul.f32 %v630_v4, %v773_v3 }
 0x1cd   :  { %v632_v7 = vpop.eup %631  ;;  %643 = vrcp.f32 %v390_v1 }
 0x1ce   :  { %v405_v9 = vmul.f32 %v632_v7, %v776_v5  ;;  %v415_v10 = vmul.f32 %v407_v6, %v749_v23 }
 0x1cf   :  { %v634_v11 = vpop.eup %633 }
 0x1d0   :  { %v408_v13 = vmul.f32 %v634_v11, %v780_v8  ;;  %v413_v14 = vmul.f32 %v405_v9, %v752_v28  ;;  %v433_v15 = vrot.slane %v415_v10, 4 }
 0x1d1   :  { %v636_v16 = vpop.eup %635 }
 0x1d2   :  { %v406_v18 = vmul.f32 %v636_v16, %v784_v12  ;;  %v416_v19 = vmul.f32 %v408_v13, %v755_v34  ;;  %v421_v20 = vrot.slane %v413_v14, 4  ;;  %v434_v21 = vadd.f32 %v433_v15, %v415_v10 }
 0x1d4   :  { %v638_v3 = vpop.eup %637  ;;  %v414_v22 = vmul.f32 %v406_v18, %v758_v39  ;;  %v422_v25 = vadd.f32 %v421_v20, %v413_v14  ;;  %v439_v5 = vrot.slane %v416_v19, 4  ;;  %v435_v29 = vrot.slane %v434_v21, 2 }
 0x1d5   :  { %v410_v23 = vmul.f32 %v638_v3, %v788_v17 }
 0x1d6   :  { %v640_v26 = vpop.eup %639  ;;  %v423_v27 = vrot.slane %v422_v25, 2  ;;  %v427_v8 = vrot.slane %v414_v22, 4  ;;  %v440_v28 = vadd.f32 %v439_v5, %v416_v19  ;;  %v436_v40 = vadd.f32 %v435_v29, %v434_v21 }
 0x1d7   :  { %v409_v30 = vmul.f32 %v640_v26, %v792_v24  ;;  %v418_v12 = vmul.f32 %v410_v23, %v760_v41 }
 0x1d8   :  { %v642_v31 = vpop.eup %641  ;;  %v424_v34 = vadd.f32 %v423_v27, %v422_v25  ;;  %v428_v33 = vadd.f32 %v427_v8, %v414_v22  ;;  %v441_v35 = vrot.slane %v440_v28, 2 }
 0x1d9   :  { %v412_v36 = vmul.f32 %v642_v31, %v796_v32  ;;  %v417_v39 = vmul.f32 %v409_v30, %v763_v43  ;;  %v451_v37 = vrot.slane %v418_v12, 4  ;;  %v437_v43 = vrot.slane %v436_v40, 1 }
 0x1da   :  { %v644_v38 = vpop.eup %643  ;;  %v429_v17 = vrot.slane %v428_v33, 2  ;;  %v442_v44 = vadd.f32 %v441_v35, %v440_v28  ;;  %v425_v41 = vrot.slane %v424_v34, 1 }
 0x1db   :  { %v411_v45 = vmul.f32 %v644_v38, %v800_v42  ;;  %v420_v47 = vmul.f32 %v412_v36, %v766_v46  ;;  %v445_v24 = vrot.slane %v417_v39, 4  ;;  %v452_v49 = vadd.f32 %v451_v37, %v418_v12 }
 0x1dc   :  { %v430_v50 = vadd.f32 %v429_v17, %v428_v33  ;;  %v443_v55 = vrot.slane %v442_v44, 1  ;;  %v426_v59 = vadd.f32 %v425_v41, %v424_v34  ;;  %v438_v0 = vadd.f32 %v437_v43, %v436_v40 }
 0x1dd   :  { %v419_v51 = vmul.f32 %v411_v45, %v769_v48  ;;  %v446_v52 = vadd.f32 %v445_v24, %v417_v39  ;;  %v453_v53 = vrot.slane %v452_v49, 2  ;;  %v463_v32 = vrot.slane %v420_v47, 4 }
 0x1de   :  { %v431_v54 = vrot.slane %v430_v50, 1  ;;  %v444_v48 = vadd.f32 %v443_v55, %v442_v44 }
 0x1df   :  { %v447_v57 = vrot.slane %v446_v52, 2  ;;  %v457_v56 = vrot.slane %v419_v51, 4  ;;  %v464_v58 = vadd.f32 %v463_v32, %v420_v47  ;;  %v454_v61 = vadd.f32 %v453_v53, %v452_v49 }
 0x1e0   :  { %v432_v42 = vadd.f32 %v431_v54, %v430_v50 }
 0x1e1   :  { %v448_v46 = vadd.f32 %v447_v57, %v446_v52  ;;  %v458_v62 = vadd.f32 %v457_v56, %v419_v51  ;;  %v465_v63 = vrot.slane %v464_v58, 2  ;;  %v455_v6 = vrot.slane %v454_v61, 1 }
 0x1e2   :  { %v478_v60 = vsel %vm477_vm1, %v432_v42, %v426_v59 }
 0x1e3   :  { %v449_v2 = vrot.slane %v448_v46, 1  ;;  %v459_v4 = vrot.slane %v458_v62, 2  ;;  %v466_v1 = vadd.f32 %v465_v63, %v464_v58  ;;  %v480_v7 = vsel %vm479_vm2, %v438_v0, %v478_v60 }
 0x1e4   :  { %v482_v11 = vsel %vm481_vm3, %v444_v48, %v480_v7  ;;  %v456_v16 = vadd.f32 %v455_v6, %v454_v61 }
 0x1e5   :  { %v450_v9 = vadd.f32 %v449_v2, %v448_v46  ;;  %v460_v10 = vadd.f32 %v459_v4, %v458_v62  ;;  %v467_v13 = vrot.slane %v466_v1, 1 }
 0x1e7   :  { %v461_v14 = vrot.slane %v460_v10, 1  ;;  %v484_v15 = vsel %vm483_vm4, %v450_v9, %v482_v11  ;;  %v468_v19 = vadd.f32 %v467_v13, %v466_v1 }
 0x1e8   :  { %v486_v20 = vsel %vm485_vm5, %v456_v16, %v484_v15 }
 0x1e9   :  { %v462_v18 = vadd.f32 %v461_v14, %v460_v10 }
 0x1eb   :  { %v488_v21 = vsel %vm487_vm6, %v462_v18, %v486_v20 }
 0x1ec   :  { %v490_v3 = vsel %vm489_vm7, %v468_v19, %v488_v21 }
 0x1ed   :  { %492 = vst [vmem:[#allocation7] sm:$0xff] %v490_v3 }
 0x1ee   :  { %696 = shalt.err (!%p693_p0)
}
 0x1ef   :  { %502 = dma.vmem_to_hbm [thread:$0]  %s500_s24, 128, %s827_s3, [#allocation4]  }
 0x1f0   :  { %709 = dma.done.wait [#allocation4], 128  }
 0x1f1   :  { %710 = vsyncadd [#allocation4], 4294967168 }
 0x1f2   :  { %506 = vsyncpa [#allocation3], 1 }
 0x1f3   :  { %507 = vsyncpa [#allocation6], 1 }
 0x1f4   :  { %508 = vsyncpa [#allocation4], 1 }

// kernel: tpu_custom_call.1
= control target key start
LH: loop header
LB: loop body
LE: loop exit
PB: predicated region body
PF: predicated region fallthrough
CT: control target
= control target key end

     0   :  { %8 = vsyncpa [#allocation3], 0  ;;  %s824_s0 = inlined_call_operand.hbm [shape: bf16[64,96], index: 0, kind: input, shape index: {}]   ;;  %s825_s1 = inlined_call_operand.hbm [shape: bf16[96,128], index: 1, kind: input, shape index: {}]   ;;  %s826_s2 = inlined_call_operand.vmem [shape: f32[1,1,128], index: 2, kind: input, shape index: {}]   ;;  %s827_s3 = inlined_call_operand.hbm [shape: f32[8,128], index: 3, kind: output, shape index: {}]  }
   0x1   :  { %9 = vsyncpa [#allocation6], 0 }
   0x2   :  { %10 = vsyncpa [#allocation4], 0  ;;  %s711_s12 = smov [#allocation2]  }
   0x3   :  { %s16_s13 = sshll.u32 %s711_s12, 4  ;;  %s17_s13 = int_to_ptr.vmem [resolvable:$true] %s16_s13 }
   0x4   :  { %s653_s14 = scalar_lea.vmem %s17_s13, 512  ;;  %p658_p1 = scmp.lt.s32.totalorder %s17_s13, %s17_s13 }
   0x5   :  { %p654_p0 = scmp.ne.s32.totalorder %s17_s13, %s653_s14  ;;  %p659_p2 = scmp.lt.s32.totalorder %s653_s14, %s653_s14 }
   0x7   :  { %p660_p3 = por %p659_p2, %p658_p1 }
   0x9   :  { %p661_p4 = pnand %p660_p3, %p654_p0 }
   0xb   :  { %664 = shalt.err (!%p661_p4)
}
   0xc   :  { %s712_s15 = smov 64   ;;  %s713_s16 = smov 4  }
   0xd   :  { %22 = dma.hbm_to_vmem [thread:$0]  %s824_s0, 512, %s17_s13, [#allocation3], %s712_s15, %s712_s15, %s713_s16  }
   0xe   :  { %s714_s19 = smov [#allocation5]  }
   0xf   :  { %s28_s20 = sshll.u32 %s714_s19, 4  ;;  %s29_s20 = int_to_ptr.vmem [resolvable:$true] %s28_s20 }
  0x10   :  { %s673_s21 = scalar_lea.vmem %s29_s20, 768  ;;  %p678_p6 = scmp.lt.s32.totalorder %s29_s20, %s29_s20 }
  0x11   :  { %p674_p5 = scmp.ne.s32.totalorder %s29_s20, %s673_s21  ;;  %p679_p7 = scmp.lt.s32.totalorder %s673_s21, %s673_s21 }
  0x13   :  { %p680_p8 = por %p679_p7, %p678_p6 }
  0x15   :  { %p681_p9 = pnand %p680_p8, %p674_p5 }
  0x17   :  { %684 = shalt.err (!%p681_p9)
}
  0x18   :  { %34 = dma.hbm_to_vmem [thread:$0]  %s825_s1, 768, %s29_s20, [#allocation6], %s712_s15, %s712_s15, %s713_s16  }
  0x19   :  { %705 = dma.done.wait [#allocation3], 512  }
  0x1a   :  { %706 = vsyncadd [#allocation3], 4294966784 }
  0x1b   :  { %707 = dma.done.wait [#allocation6], 768  }
  0x1c   :  { %708 = vsyncadd [#allocation6], 4294966528  ;;  %v587_v0 = vld [vmem:[#allocation5 + $0x28] sm:$0xff]   ;;  %v588_v1 = vld [vmem:[#allocation5 + $0x20] sm:$0xff]   ;;  %vm120_vm0 = vcmask 785408   ;;  %vm477_vm1 = vcmask 1041409  }
  0x1d   :  { %550 = vmatprep.subr.bf16.mxu0 %v587_v0  ;;  %570 = vmatprep.subr.bf16.mxu1 %v587_v0  ;;  %v589_v2 = vld [vmem:[#allocation5 + $0x18] sm:$0xff]   ;;  %v593_v3 = vld [vmem:[#allocation2] sm:$0xff]   ;;  %v594_v4 = vld [vmem:[#allocation2 + $0x10] sm:$0xff]   ;;  %vm479_vm2 = vcmask 1042434   ;;  %vm481_vm3 = vcmask 1043459   ;;  %vm483_vm4 = vcmask 1044484  }
  0x1e   :  { %551 = vmatpush3.bf16.msra.mxu0 %v587_v0  ;;  %576 = vmatpush3.bf16.msra.mxu1 %v587_v0  ;;  %v590_v5 = vld [vmem:[#allocation5 + $0x10] sm:$0xff]   ;;  %v591_v6 = vld [vmem:[#allocation5 + $0x8] sm:$0xff]   ;;  %v592_v7 = vld [vmem:[#allocation5] sm:$0xff]   ;;  %vm485_vm5 = vcmask 1045509   ;;  %vm487_vm6 = vcmask 1046534   ;;  %vm489_vm7 = vcmask 1047559  }
  0x1f   :  { %552 = vmatprep.subr.bf16.mxu0 %v588_v1  ;;  %571 = vmatprep.subr.bf16.mxu1 %v588_v1  ;;  %v595_v8 = vld [vmem:[#allocation2 + $0x8] sm:$0xff]   ;;  %v596_v9 = vld [vmem:[#allocation2 + $0x18] sm:$0xff]   ;;  %v531_v21 = vld [vmem:[%s826_s2] ss:$0 sm:$0xff]  ;;  %s715_s2 = smov [#allocation7]  }
  0x20   :  { %562 = vmatprep.mubr.msk.bf16.mxu0 %vm120_vm0, %v593_v3  ;;  %566 = vmatprep.mubr.msk.bf16.mxu1 %vm120_vm0, %v594_v4  ;;  %s499_s24 = sshll.u32 %s715_s2, 4  ;;  %s500_s24 = int_to_ptr.vmem [resolvable:$true] %s499_s24 }
  0x21   :  { %s685_s25 = scalar_lea.vmem %s500_s24, 128  ;;  %p690_p11 = scmp.lt.s32.totalorder %s500_s24, %s500_s24 }
  0x22   :  { %553 = vmatpush3.bf16.msra.mxu0 %v588_v1  ;;  %577 = vmatpush3.bf16.msra.mxu1 %v588_v1  ;;  %p686_p10 = scmp.ne.s32.totalorder %s500_s24, %s685_s25  ;;  %p691_p12 = scmp.lt.s32.totalorder %s685_s25, %s685_s25 }
  0x23   :  { %554 = vmatprep.subr.bf16.mxu0 %v589_v2  ;;  %572 = vmatprep.subr.bf16.mxu1 %v589_v2 }
  0x24   :  { %p692_p13 = por %p691_p12, %p690_p11 }
  0x26   :  { %555 = vmatpush3.bf16.msra.mxu0 %v589_v2  ;;  %578 = vmatpush3.bf16.msra.mxu1 %v589_v2  ;;  %p693_p0 = pnand %p692_p13, %p686_p10 }
  0x27   :  { %556 = vmatprep.subr.bf16.mxu0 %v590_v5  ;;  %573 = vmatprep.subr.bf16.mxu1 %v590_v5 }
  0x2a   :  { %557 = vmatpush3.bf16.msra.mxu0 %v590_v5  ;;  %579 = vmatpush3.bf16.msra.mxu1 %v590_v5 }
  0x2b   :  { %558 = vmatprep.subr.bf16.mxu0 %v591_v6  ;;  %574 = vmatprep.subr.bf16.mxu1 %v591_v6 }
  0x2e   :  { %559 = vmatpush3.bf16.msra.mxu0 %v591_v6  ;;  %580 = vmatpush3.bf16.msra.mxu1 %v591_v6 }
  0x2f   :  { %560 = vmatprep.subr.bf16.mxu0 %v592_v7  ;;  %575 = vmatprep.subr.bf16.mxu1 %v592_v7 }
  0x32   :  { %561 = vmatpush3.bf16.msra.mxu0 %v592_v7  ;;  %581 = vmatpush3.bf16.msra.mxu1 %v592_v7 }
  0x35   :  { %563 = vmatmul.mubr.msk.bf16.vlgmr.msra.gmra.mxu0 %vm120_vm0, %v595_v8  ;;  %567 = vmatmul.mubr.msk.bf16.vlgmr.msra.gmra.mxu1 %vm120_vm0, %v596_v9 }
  0xf5   :  { %v564_v10 = vpop.f32.mrf.mxu0  ;;  %v568_v11 = vpop.f32.mrf.mxu1 }
  0xf6   :  { %597 = vtanh.f32 %v564_v10 }
  0xf7   :  { %v167_v12 = vpop.f32.mrf.mxu0  ;;  %v183_v13 = vpop.f32.mrf.mxu1 }
  0xf8   :  { %599 = vtanh.f32 %v167_v12 }
  0xf9   :  { %601 = vtanh.f32 %v183_v13  ;;  %v565_v14 = vpop.f32.mrf.mxu0  ;;  %v569_v15 = vpop.f32.mrf.mxu1 }
  0xfa   :  { %603 = vtanh.f32 %v565_v14 }
  0xfb   :  { %605 = vtanh.f32 %v569_v15  ;;  %v170_v16 = vpop.f32.mrf.mxu0  ;;  %v186_v17 = vpop.f32.mrf.mxu1 }
  0xfc   :  { %607 = vtanh.f32 %v170_v16 }
  0xfd   :  { %609 = vtanh.f32 %v186_v17 }
  0xfe   :  { %611 = vtanh.f32 %v568_v11 }
 0x103   :  { %v598_v18 = vpop.eup %597 }
 0x104   :  { %v534_v19 = vpack.c.bf16 %v598_v18, %v598_v18 }
 0x105   :  { %v600_v20 = vpop.eup %599 }
 0x106   :  { %v602_v22 = vpop.eup %601  ;;  %v749_v23 = vunpack.c.l.bf16 %v534_v19  ;;  %v532_v24 = vpack.c.bf16 %v600_v20, %v600_v20 }
 0x107   :  { %v604_v25 = vpop.eup %603  ;;  %v536_v35 = vpack.c.bf16 %v602_v22, %v602_v22 }
 0x108   :  { %v606_v26 = vpop.eup %605  ;;  %v255_v27 = vmul.f32 %v531_v21, %v749_v23  ;;  %v752_v28 = vunpack.c.l.bf16 %v532_v24  ;;  %v535_v29 = vpack.c.bf16 %v604_v25, %v604_v25 }
 0x109   :  { %v608_v30 = vpop.eup %607  ;;  %v539_v40 = vpack.c.bf16 %v606_v26, %v606_v26  ;;  %v763_v43 = vunpack.c.l.bf16 %v536_v35 }
 0x10a   :  { %v610_v31 = vpop.eup %609  ;;  %v533_v32 = vpack.c.bf16 %v608_v30, %v608_v30  ;;  %265 = vadd.xlane.f32.xlu1 %v255_v27  ;;  %v253_v33 = vmul.f32 %v531_v21, %v752_v28  ;;  %v755_v34 = vunpack.c.l.bf16 %v535_v29 }
 0x10b   :  { %v612_v36 = vpop.eup %611  ;;  %v537_v37 = vpack.c.bf16 %v610_v31, %v610_v31  ;;  %v766_v46 = vunpack.c.l.bf16 %v539_v40  ;;  %v257_v47 = vmul.f32 %v531_v21, %v763_v43 }
 0x10c   :  { %261 = vadd.xlane.f32.xlu0 %v253_v33  ;;  %v256_v38 = vmul.f32 %v531_v21, %v755_v34  ;;  %v758_v39 = vunpack.c.l.bf16 %v533_v32  ;;  %v538_v44 = vpack.c.bf16 %v612_v36, %v612_v36 }
 0x10d   :  { %v760_v41 = vunpack.c.l.bf16 %v537_v37  ;;  %v260_v49 = vmul.f32 %v531_v21, %v766_v46 }
 0x10e   :  { %267 = vadd.xlane.f32.xlu1 %v256_v38  ;;  %v254_v42 = vmul.f32 %v531_v21, %v758_v39  ;;  %v769_v48 = vunpack.c.l.bf16 %v538_v44 }
 0x10f   :  { %v258_v45 = vmul.f32 %v531_v21, %v760_v41 }
 0x110   :  { %263 = vadd.xlane.f32.xlu0 %v254_v42  ;;  %v259_v50 = vmul.f32 %v531_v21, %v769_v48 }
 0x112   :  { %271 = vadd.xlane.f32.xlu1 %v258_v45 }
 0x114   :  { %269 = vadd.xlane.f32.xlu0 %v257_v47 }
 0x116   :  { %275 = vadd.xlane.f32.xlu1 %v260_v49 }
 0x118   :  { %273 = vadd.xlane.f32.xlu0 %v259_v50 }
 0x193   :  { %v266_v51 = vpop.xlane.xlu1 %265 }
 0x194   :  { %v289_v52 = vrot.slane %v266_v51, 4 }
 0x195   :  { %v262_v53 = vpop.xlane.xlu0 %261 }
 0x196   :  { %v290_v54 = vmax.f32 %v266_v51, %v289_v52  ;;  %v277_v55 = vrot.slane %v262_v53, 4 }
 0x197   :  { %v268_v56 = vpop.xlane.xlu1 %267 }
 0x198   :  { %v291_v57 = vrot.slane %v290_v54, 2  ;;  %v278_v58 = vmax.f32 %v262_v53, %v277_v55  ;;  %v295_v59 = vrot.slane %v268_v56, 4 }
 0x199   :  { %v264_v60 = vpop.xlane.xlu0 %263 }
 0x19a   :  { %v292_v61 = vmax.f32 %v290_v54, %v291_v57  ;;  %v279_v62 = vrot.slane %v278_v58, 2  ;;  %v296_v63 = vmax.f32 %v268_v56, %v295_v59  ;;  %v283_v0 = vrot.slane %v264_v60, 4 }
 0x19b   :  { %v272_v1 = vpop.xlane.xlu1 %271 }
 0x19c   :  { %v293_v2 = vrot.slane %v292_v61, 1  ;;  %v280_v3 = vmax.f32 %v278_v58, %v279_v62  ;;  %v297_v4 = vrot.slane %v296_v63, 2  ;;  %v284_v5 = vmax.f32 %v264_v60, %v283_v0 }
 0x19d   :  { %v307_v6 = vrot.slane %v272_v1, 4  ;;  %v270_v7 = vpop.xlane.xlu0 %269 }
 0x19e   :  { %v294_v8 = vmax.f32 %v292_v61, %v293_v2  ;;  %v281_v9 = vrot.slane %v280_v3, 1  ;;  %v298_v10 = vmax.f32 %v296_v63, %v297_v4  ;;  %v285_v11 = vrot.slane %v284_v5, 2 }
 0x19f   :  { %v308_v12 = vmax.f32 %v272_v1, %v307_v6  ;;  %v301_v13 = vrot.slane %v270_v7, 4  ;;  %v276_v14 = vpop.xlane.xlu1 %275 }
 0x1a0   :  { %v327_v15 = vsub.f32 %v266_v51, %v294_v8  ;;  %v282_v16 = vmax.f32 %v280_v3, %v281_v9  ;;  %v299_v17 = vrot.slane %v298_v10, 1  ;;  %v286_v18 = vmax.f32 %v284_v5, %v285_v11 }
 0x1a1   :  { %v309_v19 = vrot.slane %v308_v12, 2  ;;  %v302_v20 = vmax.f32 %v270_v7, %v301_v13  ;;  %v319_v21 = vrot.slane %v276_v14, 4  ;;  %v274_v22 = vpop.xlane.xlu0 %273 }
 0x1a2   :  { %v337_v24 = vmul.f32 1.442695, %v327_v15  ;;  %v325_v25 = vsub.f32 %v262_v53, %v282_v16  ;;  %v300_v26 = vmax.f32 %v298_v10, %v299_v17  ;;  %v287_v27 = vrot.slane %v286_v18, 1 }
 0x1a3   :  { %v310_v29 = vmax.f32 %v308_v12, %v309_v19  ;;  %v303_v30 = vrot.slane %v302_v20, 2  ;;  %v320_v31 = vmax.f32 %v276_v14, %v319_v21  ;;  %v313_v32 = vrot.slane %v274_v22, 4 }
 0x1a4   :  { %613 = vpow2.f32 %v337_v24  ;;  %v333_v33 = vmul.f32 1.442695, %v325_v25  ;;  %v328_v35 = vsub.f32 %v268_v56, %v300_v26  ;;  %v288_v36 = vmax.f32 %v286_v18, %v287_v27 }
 0x1a5   :  { %v311_v37 = vrot.slane %v310_v29, 1  ;;  %v304_v38 = vmax.f32 %v302_v20, %v303_v30  ;;  %v321_v40 = vrot.slane %v320_v31, 2  ;;  %v314_v42 = vmax.f32 %v274_v22, %v313_v32 }
 0x1a6   :  { %615 = vpow2.f32 %v333_v33  ;;  %v339_v44 = vmul.f32 1.442695, %v328_v35  ;;  %v326_v45 = vsub.f32 %v264_v60, %v288_v36 }
 0x1a7   :  { %v312_v47 = vmax.f32 %v310_v29, %v311_v37  ;;  %v305_v49 = vrot.slane %v304_v38, 1  ;;  %v322_v50 = vmax.f32 %v320_v31, %v321_v40  ;;  %v315_v51 = vrot.slane %v314_v42, 2 }
 0x1a8   :  { %617 = vpow2.f32 %v339_v44  ;;  %v335_v52 = vmul.f32 1.442695, %v326_v45 }
 0x1a9   :  { %v330_v53 = vsub.f32 %v272_v1, %v312_v47  ;;  %v306_v54 = vmax.f32 %v304_v38, %v305_v49  ;;  %v323_v55 = vrot.slane %v322_v50, 1  ;;  %v316_v57 = vmax.f32 %v314_v42, %v315_v51 }
 0x1aa   :  { %619 = vpow2.f32 %v335_v52 }
 0x1ab   :  { %v343_v56 = vmul.f32 1.442695, %v330_v53  ;;  %v329_v58 = vsub.f32 %v270_v7, %v306_v54  ;;  %v324_v59 = vmax.f32 %v322_v50, %v323_v55  ;;  %v317_v61 = vrot.slane %v316_v57, 1 }
 0x1ad   :  { %621 = vpow2.f32 %v343_v56  ;;  %v341_v62 = vmul.f32 1.442695, %v329_v58  ;;  %v332_v63 = vsub.f32 %v276_v14, %v324_v59  ;;  %v318_v0 = vmax.f32 %v316_v57, %v317_v61 }
 0x1af   :  { %623 = vpow2.f32 %v341_v62  ;;  %v347_v60 = vmul.f32 1.442695, %v332_v63  ;;  %v331_v2 = vsub.f32 %v274_v22, %v318_v0 }
 0x1b1   :  { %v773_v3 = vpop.eup %613  ;;  %625 = vpow2.f32 %v347_v60  ;;  %v345_v4 = vmul.f32 1.442695, %v331_v2 }
 0x1b2   :  { %v361_v1 = vrot.slane %v773_v3, 4 }
 0x1b3   :  { %v776_v5 = vpop.eup %615  ;;  %627 = vpow2.f32 %v345_v4 }
 0x1b4   :  { %v362_v6 = vadd.f32 %v773_v3, %v361_v1  ;;  %v349_v7 = vrot.slane %v776_v5, 4 }
 0x1b5   :  { %v780_v8 = vpop.eup %617 }
 0x1b6   :  { %v363_v9 = vrot.slane %v362_v6, 2  ;;  %v350_v10 = vadd.f32 %v776_v5, %v349_v7  ;;  %v367_v11 = vrot.slane %v780_v8, 4 }
 0x1b7   :  { %v784_v12 = vpop.eup %619 }
 0x1b8   :  { %v364_v13 = vadd.f32 %v363_v9, %v362_v6  ;;  %v351_v14 = vrot.slane %v350_v10, 2  ;;  %v368_v15 = vadd.f32 %v780_v8, %v367_v11  ;;  %v355_v16 = vrot.slane %v784_v12, 4 }
 0x1ba   :  { %v788_v17 = vpop.eup %621  ;;  %v365_v18 = vrot.slane %v364_v13, 1  ;;  %v352_v19 = vadd.f32 %v351_v14, %v350_v10  ;;  %v369_v20 = vrot.slane %v368_v15, 2  ;;  %v356_v21 = vadd.f32 %v784_v12, %v355_v16 }
 0x1bb   :  { %v379_v22 = vrot.slane %v788_v17, 4 }
 0x1bc   :  { %v792_v24 = vpop.eup %623  ;;  %v366_v25 = vadd.f32 %v365_v18, %v364_v13  ;;  %v353_v26 = vrot.slane %v352_v19, 1  ;;  %v370_v27 = vadd.f32 %v369_v20, %v368_v15  ;;  %v357_v29 = vrot.slane %v356_v21, 2 }
 0x1bd   :  { %v380_v30 = vadd.f32 %v788_v17, %v379_v22  ;;  %v373_v31 = vrot.slane %v792_v24, 4 }
 0x1be   :  { %v796_v32 = vpop.eup %625  ;;  %v354_v33 = vadd.f32 %v353_v26, %v352_v19  ;;  %v371_v35 = vrot.slane %v370_v27, 1  ;;  %v358_v36 = vadd.f32 %v357_v29, %v356_v21  ;;  %629 = vrcp.f32 %v366_v25 }
 0x1bf   :  { %v381_v37 = vrot.slane %v380_v30, 2  ;;  %v374_v38 = vadd.f32 %v792_v24, %v373_v31  ;;  %v391_v40 = vrot.slane %v796_v32, 4 }
 0x1c0   :  { %v800_v42 = vpop.eup %627  ;;  %631 = vrcp.f32 %v354_v33  ;;  %v359_v44 = vrot.slane %v358_v36, 1  ;;  %v372_v45 = vadd.f32 %v371_v35, %v370_v27 }
 0x1c1   :  { %v375_v47 = vrot.slane %v374_v38, 2  ;;  %v385_v49 = vrot.slane %v800_v42, 4  ;;  %v382_v50 = vadd.f32 %v381_v37, %v380_v30  ;;  %v392_v51 = vadd.f32 %v796_v32, %v391_v40 }
 0x1c2   :  { %v360_v52 = vadd.f32 %v359_v44, %v358_v36  ;;  %633 = vrcp.f32 %v372_v45 }
 0x1c3   :  { %v376_v53 = vadd.f32 %v375_v47, %v374_v38  ;;  %v386_v54 = vadd.f32 %v800_v42, %v385_v49  ;;  %v383_v55 = vrot.slane %v382_v50, 1  ;;  %v393_v57 = vrot.slane %v392_v51, 2 }
 0x1c4   :  { %635 = vrcp.f32 %v360_v52 }
 0x1c5   :  { %v377_v56 = vrot.slane %v376_v53, 1  ;;  %v384_v58 = vadd.f32 %v383_v55, %v382_v50  ;;  %v387_v59 = vrot.slane %v386_v54, 2  ;;  %v394_v61 = vadd.f32 %v393_v57, %v392_v51 }
 0x1c7   :  { %v378_v62 = vadd.f32 %v377_v56, %v376_v53  ;;  %v388_v63 = vadd.f32 %v387_v59, %v386_v54  ;;  %v395_v0 = vrot.slane %v394_v61, 1  ;;  %637 = vrcp.f32 %v384_v58 }
 0x1c9   :  { %v389_v60 = vrot.slane %v388_v63, 1  ;;  %v396_v2 = vadd.f32 %v395_v0, %v394_v61  ;;  %639 = vrcp.f32 %v378_v62 }
 0x1cb   :  { %v630_v4 = vpop.eup %629  ;;  %v390_v1 = vadd.f32 %v389_v60, %v388_v63  ;;  %641 = vrcp.f32 %v396_v2 }
 0x1cc   :  { %v407_v6 = vmul.f32 %v630_v4, %v773_v3 }
 0x1cd   :  { %v632_v7 = vpop.eup %631  ;;  %643 = vrcp.f32 %v390_v1 }
 0x1ce   :  { %v405_v9 = vmul.f32 %v632_v7, %v776_v5  ;;  %v415_v10 = vmul.f32 %v407_v6, %v749_v23 }
 0x1cf   :  { %v634_v11 = vpop.eup %633 }
 0x1d0   :  { %v408_v13 = vmul.f32 %v634_v11, %v780_v8  ;;  %v413_v14 = vmul.f32 %v405_v9, %v752_v28  ;;  %v433_v15 = vrot.slane %v415_v10, 4 }
 0x1d1   :  { %v636_v16 = vpop.eup %635 }
 0x1d2   :  { %v406_v18 = vmul.f32 %v636_v16, %v784_v12  ;;  %v416_v19 = vmul.f32 %v408_v13, %v755_v34  ;;  %v421_v20 = vrot.slane %v413_v14, 4  ;;  %v434_v21 = vadd.f32 %v433_v15, %v415_v10 }
 0x1d4   :  { %v638_v3 = vpop.eup %637  ;;  %v414_v22 = vmul.f32 %v406_v18, %v758_v39  ;;  %v422_v25 = vadd.f32 %v421_v20, %v413_v14  ;;  %v439_v5 = vrot.slane %v416_v19, 4  ;;  %v435_v29 = vrot.slane %v434_v21, 2 }
 0x1d5   :  { %v410_v23 = vmul.f32 %v638_v3, %v788_v17 }
 0x1d6   :  { %v640_v26 = vpop.eup %639  ;;  %v423_v27 = vrot.slane %v422_v25, 2  ;;  %v427_v8 = vrot.slane %v414_v22, 4  ;;  %v440_v28 = vadd.f32 %v439_v5, %v416_v19  ;;  %v436_v40 = vadd.f32 %v435_v29, %v434_v21 }
 0x1d7   :  { %v409_v30 = vmul.f32 %v640_v26, %v792_v24  ;;  %v418_v12 = vmul.f32 %v410_v23, %v760_v41 }
 0x1d8   :  { %v642_v31 = vpop.eup %641  ;;  %v424_v34 = vadd.f32 %v423_v27, %v422_v25  ;;  %v428_v33 = vadd.f32 %v427_v8, %v414_v22  ;;  %v441_v35 = vrot.slane %v440_v28, 2 }
 0x1d9   :  { %v412_v36 = vmul.f32 %v642_v31, %v796_v32  ;;  %v417_v39 = vmul.f32 %v409_v30, %v763_v43  ;;  %v451_v37 = vrot.slane %v418_v12, 4  ;;  %v437_v43 = vrot.slane %v436_v40, 1 }
 0x1da   :  { %v644_v38 = vpop.eup %643  ;;  %v429_v17 = vrot.slane %v428_v33, 2  ;;  %v442_v44 = vadd.f32 %v441_v35, %v440_v28  ;;  %v425_v41 = vrot.slane %v424_v34, 1 }
 0x1db   :  { %v411_v45 = vmul.f32 %v644_v38, %v800_v42  ;;  %v420_v47 = vmul.f32 %v412_v36, %v766_v46  ;;  %v445_v24 = vrot.slane %v417_v39, 4  ;;  %v452_v49 = vadd.f32 %v451_v37, %v418_v12 }
 0x1dc   :  { %v430_v50 = vadd.f32 %v429_v17, %v428_v33  ;;  %v443_v55 = vrot.slane %v442_v44, 1  ;;  %v426_v59 = vadd.f32 %v425_v41, %v424_v34  ;;  %v438_v0 = vadd.f32 %v437_v43, %v436_v40 }
 0x1dd   :  { %v419_v51 = vmul.f32 %v411_v45, %v769_v48  ;;  %v446_v52 = vadd.f32 %v445_v24, %v417_v39  ;;  %v453_v53 = vrot.slane %v452_v49, 2  ;;  %v463_v32 = vrot.slane %v420_v47, 4 }
 0x1de   :  { %v431_v54 = vrot.slane %v430_v50, 1  ;;  %v444_v48 = vadd.f32 %v443_v55, %v442_v44 }
 0x1df   :  { %v447_v57 = vrot.slane %v446_v52, 2  ;;  %v457_v56 = vrot.slane %v419_v51, 4  ;;  %v464_v58 = vadd.f32 %v463_v32, %v420_v47  ;;  %v454_v61 = vadd.f32 %v453_v53, %v452_v49 }
 0x1e0   :  { %v432_v42 = vadd.f32 %v431_v54, %v430_v50 }
 0x1e1   :  { %v448_v46 = vadd.f32 %v447_v57, %v446_v52  ;;  %v458_v62 = vadd.f32 %v457_v56, %v419_v51  ;;  %v465_v63 = vrot.slane %v464_v58, 2  ;;  %v455_v6 = vrot.slane %v454_v61, 1 }
 0x1e2   :  { %v478_v60 = vsel %vm477_vm1, %v432_v42, %v426_v59 }
 0x1e3   :  { %v449_v2 = vrot.slane %v448_v46, 1  ;;  %v459_v4 = vrot.slane %v458_v62, 2  ;;  %v466_v1 = vadd.f32 %v465_v63, %v464_v58  ;;  %v480_v7 = vsel %vm479_vm2, %v438_v0, %v478_v60 }
 0x1e4   :  { %v482_v11 = vsel %vm481_vm3, %v444_v48, %v480_v7  ;;  %v456_v16 = vadd.f32 %v455_v6, %v454_v61 }
 0x1e5   :  { %v450_v9 = vadd.f32 %v449_v2, %v448_v46  ;;  %v460_v10 = vadd.f32 %v459_v4, %v458_v62  ;;  %v467_v13 = vrot.slane %v466_v1, 1 }
 0x1e7   :  { %v461_v14 = vrot.slane %v460_v10, 1  ;;  %v484_v15 = vsel %vm483_vm4, %v450_v9, %v482_v11  ;;  %v468_v19 = vadd.f32 %v467_v13, %v466_v1 }
 0x1e8   :  { %v486_v20 = vsel %vm485_vm5, %v456_v16, %v484_v15 }
 0x1e9   :  { %v462_v18 = vadd.f32 %v461_v14, %v460_v10 }
 0x1eb   :  { %v488_v21 = vsel %vm487_vm6, %v462_v18, %v486_v20 }
 0x1ec   :  { %v490_v3 = vsel %vm489_vm7, %v468_v19, %v488_v21 }
 0x1ed   :  { %492 = vst [vmem:[#allocation7] sm:$0xff] %v490_v3 }
 0x1ee   :  { %696 = shalt.err (!%p693_p0)
}
 0x1ef   :  { %502 = dma.vmem_to_hbm [thread:$0]  %s500_s24, 128, %s827_s3, [#allocation4]  }
 0x1f0   :  { %709 = dma.done.wait [#allocation4], 128  }
 0x1f1   :  { %710 = vsyncadd [#allocation4], 4294967168 }
 0x1f2   :  { %506 = vsyncpa [#allocation3], 1 }
 0x1f3   :  { %507 = vsyncpa [#allocation6], 1 }
 0x1f4   :  { %508 = vsyncpa [#allocation4], 1 }

</bundles_post_ra>
